<compile_context>
chip_gen: v5e
topology: v5e:2x2
jax: 0.10.0
libtpu: 0.0.40
codegen_flags: <defaults>
</compile_context>

<pallas_src>
import functools
import jax
import jax.numpy as jnp
from jax.experimental import pallas as pl
from jax.experimental.pallas import tpu as pltpu

# =============================================================================
# Config — architecture-faithful but spatially scaled down (original: 96^3 input,
# feat_size=(3,3,3); here IMG=32 -> feat_size=(1,1,1), token counts scale too).
# =============================================================================
B_SZ, IMG, IN_CH, OUT_CH = 2, 32, 4, 4
FEATURE, HIDDEN, HEADS = 16, 256, 4
DIMS = [32, 64, 128, 256]
DEPTHS = [3, 3, 3, 3]
STEM_K = 4
FEAT = IMG // 32                                   # bottleneck spatial extent
ENC_N = [(IMG // 4) ** 3, (IMG // 8) ** 3, (IMG // 16) ** 3, (IMG // 32) ** 3]
PROJ_E = [64, 64, 64, 32]                          # encoder EPA projection sizes
PROJ_D = 64                                        # decoder EPA projection size
DEC_DEPTH = 3

_VMEM_LIMIT = 48 * 1024 * 1024                     # safe on v7x (64 MiB/TC), fine on v5e/v6e


def _cparams(sem):
    return pltpu.CompilerParams(dimension_semantics=sem,
                                vmem_limit_bytes=_VMEM_LIMIT)


def _ceil_to(x, m):
    return ((x + m - 1) // m) * m


# =============================================================================
# Pallas kernels.
# =============================================================================
def _matmul_bias_kernel(a_ref, b_ref, bias_ref, o_ref):
    o_ref[...] = (jnp.dot(a_ref[...], b_ref[...],
                          preferred_element_type=jnp.float32)
                  + bias_ref[...])


def matmul(a, b, bias=None):
    """(M, K) @ (K, N) (+ bias) on the MXU; bf16 inputs, f32 accumulate/output."""
    M, K = a.shape
    N = b.shape[1]
    if K % 8:                                       # only the Cin=4 case pads
        pad = 8 - K % 8
        a = jnp.pad(a, ((0, 0), (0, pad)))
        b = jnp.pad(b, ((0, pad), (0, 0)))
        K = K + pad
    a = a.astype(jnp.bfloat16)
    b = b.astype(jnp.bfloat16)
    if M >= 8192:
        tm = 1024
    elif M >= 512:
        tm = 512
    else:
        tm = max(8, _ceil_to(M, 8))
    Mp = _ceil_to(M, tm)
    if Mp != M:
        a = jnp.pad(a, ((0, Mp - M), (0, 0)))
    bias2 = (jnp.zeros((1, N), jnp.float32) if bias is None
             else bias.reshape(1, N).astype(jnp.float32))
    out = pl.pallas_call(
        _matmul_bias_kernel,
        grid=(Mp // tm,),
        in_specs=[pl.BlockSpec((tm, K), lambda i: (i, 0)),
                  pl.BlockSpec((K, N), lambda i: (0, 0)),
                  pl.BlockSpec((1, N), lambda i: (0, 0))],
        out_specs=pl.BlockSpec((tm, N), lambda i: (i, 0)),
        out_shape=jax.ShapeDtypeStruct((Mp, N), jnp.float32),
        compiler_params=_cparams(("parallel",)),
    )(a, b, bias2)
    return out[:M] if Mp != M else out


def _conv3x3_kernel(x0_ref, x1_ref, x2_ref, w_ref, o_ref, *, H, W, cin, cout):
    """One output z-slice of a 3x3x3 (stride-1, pad-1) conv.

    x{0,1,2}_ref: (1, 1, H+2, W+2, cin) bf16 padded input slices z, z+1, z+2.
    w_ref:        (3, 3, 3, cin, cout)  bf16 taps, resident in VMEM.
    o_ref:        (1, 1, H, W, cout)    f32 output slice.
    The 27 taps accumulate in an f32 accumulator; the 27x im2col matrix is
    never materialized in HBM.
    """
    acc = jnp.zeros((H * W, cout), jnp.float32)
    for dz, xref in enumerate((x0_ref, x1_ref, x2_ref)):
        for dy in range(3):
            for dx in range(3):
                tap = xref[0, 0, dy:dy + H, dx:dx + W, :].reshape(H * W, cin)
                acc = acc + jnp.dot(tap, w_ref[dz, dy, dx],
                                    preferred_element_type=jnp.float32)
    o_ref[0, 0] = acc.reshape(H, W, cout)


def conv3d_k3s1p1(x, w):
    """3x3x3 conv, stride 1, pad 1, no bias.  x: (B,D,H,W,Cin); w: (Cout,Cin,3,3,3)."""
    B, D, H, W, cin = x.shape
    cout = w.shape[0]
    xp = jnp.pad(x.astype(jnp.bfloat16), ((0, 0), (1, 1), (1, 1), (1, 1), (0, 0)))
    wt = jnp.transpose(w, (2, 3, 4, 1, 0)).astype(jnp.bfloat16)     # (3,3,3,cin,cout)

    def xspec(dz):
        return pl.BlockSpec((1, 1, H + 2, W + 2, cin),
                            lambda b, z: (b, z + dz, 0, 0, 0))

    return pl.pallas_call(
        functools.partial(_conv3x3_kernel, H=H, W=W, cin=cin, cout=cout),
        grid=(B, D),
        in_specs=[xspec(0), xspec(1), xspec(2),
                  pl.BlockSpec((3, 3, 3, cin, cout),
                               lambda b, z: (0, 0, 0, 0, 0))],
        out_specs=pl.BlockSpec((1, 1, H, W, cout), lambda b, z: (b, z, 0, 0, 0)),
        out_shape=jax.ShapeDtypeStruct((B, D, H, W, cout), jnp.float32),
        compiler_params=_cparams(("parallel", "arbitrary")),
    )(xp, xp, xp, wt)


def _rownorm_affine_kernel(x_ref, w_ref, b_ref, o_ref, *, eps):
    x = x_ref[...].astype(jnp.float32)
    m = jnp.mean(x, axis=-1, keepdims=True)
    xc = x - m
    v = jnp.mean(xc * xc, axis=-1, keepdims=True)
    o_ref[...] = xc * jax.lax.rsqrt(v + eps) * w_ref[...] + b_ref[...]


def rownorm_affine(x, w, b, eps=1e-5):
    """Per-row (x - mean)/sqrt(var+eps) * w + b, affine fused in-kernel."""
    R, S = x.shape
    tr = min(512, _ceil_to(R, 8))
    Rp = _ceil_to(R, tr)
    if Rp != R:
        x = jnp.pad(x, ((0, Rp - R), (0, 0)))
    out = pl.pallas_call(
        functools.partial(_rownorm_affine_kernel, eps=eps),
        grid=(Rp // tr,),
        in_specs=[pl.BlockSpec((tr, S), lambda i: (i, 0)),
                  pl.BlockSpec((1, S), lambda i: (0, 0)),
                  pl.BlockSpec((1, S), lambda i: (0, 0))],
        out_specs=pl.BlockSpec((tr, S), lambda i: (i, 0)),
        out_shape=jax.ShapeDtypeStruct((Rp, S), jnp.float32),
        compiler_params=_cparams(("parallel",)),
    )(x, w, b)
    return out[:R] if Rp != R else out


# =============================================================================
# Neural-net building blocks (glue in JAX, heavy lifting in the kernels above).
# =============================================================================
def lrelu(x):
    return jnp.where(x >= 0, x, 0.01 * x)


def linear(x, w, b=None):
    """nn.Linear semantics: w is (out, in); bias fused into the matmul kernel."""
    y = matmul(x.reshape(-1, x.shape[-1]), jnp.transpose(w), b)
    return y.reshape(x.shape[:-1] + (w.shape[0],))


def conv3d_1x1(x, w, b=None):
    cout, cin = w.shape[0], w.shape[1]
    y = matmul(x.reshape(-1, cin), jnp.transpose(w.reshape(cout, cin)), b)
    return y.reshape(x.shape[:-1] + (cout,))


def conv3d_patch(x, w, k):
    """k^3 conv with stride k (patchify), no bias.  w: (Cout, Cin, k, k, k)."""
    B, D, H, W, cin = x.shape
    cout = w.shape[0]
    xr = x.reshape(B, D // k, k, H // k, k, W // k, k, cin)
    xr = jnp.transpose(xr, (0, 1, 3, 5, 2, 4, 6, 7)).reshape(-1, k * k * k * cin)
    wm = jnp.transpose(w, (2, 3, 4, 1, 0)).reshape(k * k * k * cin, cout)
    return matmul(xr, wm).reshape(B, D // k, H // k, W // k, cout)


def conv_transpose3d(x, w, k):
    """ConvTranspose3d with kernel == stride == k, no bias. w: (Cin, Cout, k, k, k)."""
    B, D, H, W, cin = x.shape
    cout = w.shape[1]
    wm = jnp.transpose(w, (0, 2, 3, 4, 1)).reshape(cin, k * k * k * cout)
    y = matmul(x.reshape(-1, cin), wm).reshape(B, D, H, W, k, k, k, cout)
    y = jnp.transpose(y, (0, 1, 4, 2, 5, 3, 6, 7))
    return y.reshape(B, D * k, H * k, W * k, cout)


def group_norm(x, w, b, groups, eps=1e-5):
    """Channels-last GroupNorm (no transposes): stats per (batch, group)."""
    B, C = x.shape[0], x.shape[-1]
    cg = C // groups
    xr = x.reshape(B, -1, groups, cg)
    m = jnp.mean(xr, axis=(1, 3), keepdims=True)
    xc = xr - m
    v = jnp.mean(xc * xc, axis=(1, 3), keepdims=True)
    y = (xc * jax.lax.rsqrt(v + eps)).reshape(x.shape)
    return y * w + b


def instance_norm(x, w, b, eps=1e-5):
    return group_norm(x, w, b, groups=x.shape[-1], eps=eps)


def layer_norm(x, w, b, eps=1e-5):
    C = x.shape[-1]
    y = rownorm_affine(x.reshape(-1, C), w.reshape(1, C), b.reshape(1, C), eps)
    return y.reshape(x.shape)


def batch_norm_eval(x, p, eps=1e-5):
    # Eval-mode BatchNorm3d with (init) running stats (rm=0, rv=1).
    return (x - p['rm']) * jax.lax.rsqrt(p['rv'] + eps) * p['w'] + p['b']


def apply_norm(x, p, kind):
    return batch_norm_eval(x, p) if kind == 'batch' else instance_norm(x, p['w'], p['b'])


def l2normalize(x, eps=1e-12):
    n = jnp.sqrt(jnp.sum(x * x, axis=-1, keepdims=True))
    return x / jnp.maximum(n, eps)


def unet_res_block(x, p):
    residual = x
    out = conv3d_k3s1p1(x, p['conv1_w'])
    out = apply_norm(out, p['norm1'], p['kind'])
    out = lrelu(out)
    out = conv3d_k3s1p1(out, p['conv2_w'])
    out = apply_norm(out, p['norm2'], p['kind'])
    if 'conv3_w' in p:
        residual = conv3d_1x1(residual, p['conv3_w'])
        residual = apply_norm(residual, p['norm3'], p['kind'])
    return lrelu(out + residual)


def epa(x, p):
    """Efficient Paired Attention: channel + spatial branches with shared q/k."""
    B, N, C = x.shape
    c = C // HEADS
    qkvv = linear(x, p['qkvv_w']).reshape(B, N, 4, HEADS, c)
    qkvv = jnp.transpose(qkvv, (2, 0, 3, 1, 4))                       # (4,B,h,N,c)
    q, k, v_ca, v_sa = [jnp.swapaxes(qkvv[i], -2, -1) for i in range(4)]  # (B,h,c,N)
    k_proj = linear(k, p['E_w'], p['E_b'])                            # (B,h,c,P)
    v_sa_proj = linear(v_sa, p['E_w'], p['E_b'])                      # shared E == F
    qn, kn = l2normalize(q), l2normalize(k)
    # Tiny attention GEMMs left to XLA (per perf review: <3% MXU util as Pallas).
    attn_ca = jnp.einsum('bhcn,bhdn->bhcd', qn, kn) * p['temperature']
    attn_ca = jax.nn.softmax(attn_ca, axis=-1)
    x_ca = jnp.einsum('bhcd,bhdn->bhcn', attn_ca, v_ca)               # (B,h,c,N)
    x_ca = jnp.transpose(x_ca, (0, 3, 1, 2)).reshape(B, N, C)
    attn_sa = jnp.einsum('bhcn,bhcp->bhnp', qn, k_proj) * p['temperature2']
    attn_sa = jax.nn.softmax(attn_sa, axis=-1)
    x_sa = jnp.einsum('bhnp,bhcp->bhnc', attn_sa, v_sa_proj)          # (B,h,N,c)
    x_sa = jnp.transpose(x_sa, (0, 2, 1, 3)).reshape(B, N, C)         # head concat
    x_sa = linear(x_sa, p['out_proj_w'], p['out_proj_b'])
    x_ca = linear(x_ca, p['out_proj2_w'], p['out_proj2_b'])
    return jnp.concatenate([x_sa, x_ca], axis=-1)


def transformer_block(x, p):
    B, D, H, W, C = x.shape
    N = D * H * W
    xt = x.reshape(B, N, C) + p['pos_embed']
    nx = layer_norm(xt, p['ln_w'], p['ln_b'])
    attn = xt + p['gamma'] * epa(nx, p['epa'])
    attn_skip = attn.reshape(B, D, H, W, C)
    y = unet_res_block(attn_skip, p['conv51'])
    y = conv3d_1x1(y, p['conv8_w'], p['conv8_b'])   # Dropout3d(0.1) is a no-op in eval
    return attn_skip + y


def encoder_forward(x, p):
    hidden = []
    h = conv3d_patch(x, p['stem_w'], STEM_K)
    h = group_norm(h, p['stem_gn']['w'], p['stem_gn']['b'], groups=IN_CH)
    for bp in p['stages'][0]:
        h = transformer_block(h, bp)
    hidden.append(h)
    for i in range(1, 4):
        dp = p['downs'][i - 1]
        h = conv3d_patch(h, dp['w'], 2)
        h = group_norm(h, dp['gn']['w'], dp['gn']['b'], groups=DIMS[i - 1])
        for bp in p['stages'][i]:
            h = transformer_block(h, bp)
        if i == 3:
            Bc, a1, a2, a3, Cc = h.shape
            h = h.reshape(Bc, a1 * a2 * a3, Cc)      # "b c h w d -> b (h w d) c"
        hidden.append(h)
    return h, hidden


def unetr_up_block(inp, skip, p):
    out = conv_transpose3d(inp, p['transp_w'], p['up_k']) + skip
    if 'res' in p:
        out = unet_res_block(out, p['res'])
    else:
        for bp in p['blocks']:
            out = transformer_block(out, bp)
    return out


def unetr_pp_ae_forward(x_ncdhw, params):
    """Eval-mode UNETR_PP_AE.forward -> (logits, ae_logits, ae_out) in NCDHW."""
    # TODO(synk): training-mode deep supervision (out2/out3 + F.interpolate + torch.stack)
    # is not implemented; this reproduces the eval-mode branch of forward().
    x = jnp.transpose(x_ncdhw, (0, 2, 3, 4, 1)).astype(jnp.float32)
    _, hidden = encoder_forward(x, params['encoder'])
    conv_block = unet_res_block(x, params['encoder1'])
    enc1, enc2, enc3, enc4 = hidden
    B = x.shape[0]
    dec4 = enc4.reshape(B, FEAT, FEAT, FEAT, HIDDEN)                  # proj_feat
    dec3 = unetr_up_block(dec4, enc3, params['decoder5'])
    dec2 = unetr_up_block(dec3, enc2, params['decoder4'])
    dec1 = unetr_up_block(dec2, enc1, params['decoder3'])
    out = unetr_up_block(dec1, conv_block, params['decoder2'])
    logits = conv3d_1x1(out, params['out1_w'], params['out1_b'])
    ae_dec3 = unetr_up_block(dec4, enc3, params['ae_decoder5'])
    ae_dec2 = unetr_up_block(ae_dec3, enc2, params['ae_decoder4'])
    ae_dec1 = unetr_up_block(ae_dec2, enc1, params['ae_decoder3'])
    ae_out = unetr_up_block(ae_dec1, conv_block, params['ae_decoder2'])
    ae_logits = conv3d_1x1(ae_out, params['ae_out1_w'], params['ae_out1_b'])
    to_ncdhw = lambda t: jnp.transpose(t, (0, 4, 1, 2, 3))
    return to_ncdhw(logits), to_ncdhw(ae_logits), to_ncdhw(ae_out)


# =============================================================================
# Deterministic synthetic parameter initialization (shapes per module __init__).
# =============================================================================
_MASTER = jax.random.PRNGKey(1234)
_CNT = [0]


def _rand(shape, scale=0.02):
    k = jax.random.fold_in(_MASTER, _CNT[0])
    _CNT[0] += 1
    return (scale * jax.random.normal(k, shape)).astype(jnp.float32)


def _zeros(s):
    return jnp.zeros(s, jnp.float32)


def _ones(s):
    return jnp.ones(s, jnp.float32)


def _norm_p(c, kind):
    p = {'w': _ones((c,)), 'b': _zeros((c,))}
    if kind == 'batch':
        p['rm'], p['rv'] = _zeros((c,)), _ones((c,))
    return p


def _resblock_p(cin, cout, kind='instance'):
    p = {'kind': kind,
         'conv1_w': _rand((cout, cin, 3, 3, 3)),
         'conv2_w': _rand((cout, cout, 3, 3, 3)),
         'norm1': _norm_p(cout, kind), 'norm2': _norm_p(cout, kind)}
    if cin != cout:
        p['conv3_w'] = _rand((cout, cin, 1, 1, 1))
        p['norm3'] = _norm_p(cout, kind)
    return p


def _tb_p(input_size, hidden, proj):
    return {
        'pos_embed': _rand((1, input_size, hidden)),
        'ln_w': _ones((hidden,)), 'ln_b': _zeros((hidden,)),
        'gamma': jnp.full((hidden,), 1e-6, jnp.float32),
        'epa': {
            'qkvv_w': _rand((4 * hidden, hidden)),
            'E_w': _rand((proj, input_size)), 'E_b': _zeros((proj,)),
            'temperature': _ones((HEADS, 1, 1)), 'temperature2': _ones((HEADS, 1, 1)),
            'out_proj_w': _rand((hidden // 2, hidden)), 'out_proj_b': _zeros((hidden // 2,)),
            'out_proj2_w': _rand((hidden // 2, hidden)), 'out_proj2_b': _zeros((hidden // 2,)),
        },
        'conv51': _resblock_p(hidden, hidden, 'batch'),
        'conv8_w': _rand((hidden, hidden, 1, 1, 1)), 'conv8_b': _zeros((hidden,)),
    }


def _up_p(cin, cout, up_k, out_size, conv_decoder):
    p = {'transp_w': _rand((cin, cout, up_k, up_k, up_k)), 'up_k': up_k}
    if conv_decoder:
        p['res'] = _resblock_p(cout, cout, 'instance')
    else:
        p['blocks'] = [_tb_p(out_size, cout, PROJ_D) for _ in range(DEC_DEPTH)]
    return p


def build_params():
    enc = {
        'stem_w': _rand((DIMS[0], IN_CH, STEM_K, STEM_K, STEM_K)),
        'stem_gn': {'w': _ones((DIMS[0],)), 'b': _zeros((DIMS[0],))},
        'downs': [{'w': _rand((DIMS[i + 1], DIMS[i], 2, 2, 2)),
                   'gn': {'w': _ones((DIMS[i + 1],)), 'b': _zeros((DIMS[i + 1],))}}
                  for i in range(3)],
        'stages': [[_tb_p(ENC_N[i], DIMS[i], PROJ_E[i]) for _ in range(DEPTHS[i])]
                   for i in range(4)],
    }
    return {
        'encoder': enc,
        'encoder1': _resblock_p(IN_CH, FEATURE, 'instance'),
        'decoder5': _up_p(FEATURE * 16, FEATURE * 8, 2, ENC_N[2], False),
        'decoder4': _up_p(FEATURE * 8, FEATURE * 4, 2, ENC_N[1], False),
        'decoder3': _up_p(FEATURE * 4, FEATURE * 2, 2, ENC_N[0], False),
        'decoder2': _up_p(FEATURE * 2, FEATURE, 4, IMG ** 3, True),
        'out1_w': _rand((OUT_CH, FEATURE, 1, 1, 1)), 'out1_b': _zeros((OUT_CH,)),
        'ae_decoder5': _up_p(FEATURE * 16, FEATURE * 8, 2, ENC_N[2], False),
        'ae_decoder4': _up_p(FEATURE * 8, FEATURE * 4, 2, ENC_N[1], False),
        'ae_decoder3': _up_p(FEATURE * 4, FEATURE * 2, 2, ENC_N[0], False),
        'ae_decoder2': _up_p(FEATURE * 2, FEATURE, 4, IMG ** 3, True),
        'ae_out1_w': _rand((IN_CH, FEATURE, 1, 1, 1)), 'ae_out1_b': _zeros((IN_CH,)),
    }


if __name__ == "__main__":
    params = build_params()
    x_in = jax.random.normal(jax.random.PRNGKey(0), (B_SZ, IN_CH, IMG, IMG, IMG), jnp.float32)
    logits, ae_logits, ae_out = unetr_pp_ae_forward(x_in, params)
    jax.block_until_ready((logits, ae_logits, ae_out))
    assert logits.shape == (B_SZ, OUT_CH, IMG, IMG, IMG)
    assert ae_logits.shape == (B_SZ, IN_CH, IMG, IMG, IMG)
    assert ae_out.shape == (B_SZ, FEATURE, IMG, IMG, IMG)
    assert bool(jnp.isfinite(logits).all()) and bool(jnp.isfinite(ae_logits).all())
    print("KERNEL_OK")
</pallas_src>

<mosaic_0001>
module attributes {stable_mosaic.version = 11 : i64} {
  func.func @_matmul_bias_kernel(%arg0: i32, %arg1: memref<512x256xbf16, #tpu.memory_space<vmem>>, %arg2: memref<256x32xbf16, #tpu.memory_space<vmem>>, %arg3: memref<1x32xf32, #tpu.memory_space<vmem>>, %arg4: memref<512x32xf32, #tpu.memory_space<vmem>>) attributes {dimension_semantics = [#tpu.dimension_semantics<parallel>], iteration_bounds = array<i64: 2>, scalar_prefetch = 0 : i64, scratch_operands = 0 : i64, tpu.core_type = #tpu.core_type<tc>, window_params = [{transform_indices = @transform_0, window_bounds = array<i64: 512, 256>}, {pipeline_mode = #tpu.pipeline_mode<synchronous>, transform_indices = @transform_1, window_bounds = array<i64: 256, 32>}, {pipeline_mode = #tpu.pipeline_mode<synchronous>, transform_indices = @transform_2, window_bounds = array<i64: 1, 32>}, {transform_indices = @transform_3, window_bounds = array<i64: 512, 32>}]} {
    %c0 = arith.constant 0 : index
    %c0_0 = arith.constant 0 : index
    %0 = vector.load %arg1[%c0, %c0_0] : memref<512x256xbf16, #tpu.memory_space<vmem>>, vector<512x256xbf16>
    %c0_1 = arith.constant 0 : index
    %c0_2 = arith.constant 0 : index
    %1 = vector.load %arg2[%c0_1, %c0_2] : memref<256x32xbf16, #tpu.memory_space<vmem>>, vector<256x32xbf16>
    %cst = arith.constant dense<0.000000e+00> : vector<512x32xf32>
    %2 = tpu.matmul %0, %1, %cst {dimension_numbers = #tpu.dot_dimension_numbers<[1], [0], [0], [1], [0, 0, 1, 1], [], []>} : vector<512x256xbf16>, vector<256x32xbf16>, vector<512x32xf32> -> vector<512x32xf32>
    %c0_3 = arith.constant 0 : index
    %c0_4 = arith.constant 0 : index
    %3 = vector.load %arg3[%c0_3, %c0_4] : memref<1x32xf32, #tpu.memory_space<vmem>>, vector<1x32xf32>
    %4 = vector.broadcast %3 : vector<1x32xf32> to vector<512x32xf32>
    %5 = arith.addf %2, %4 : vector<512x32xf32>
    %c0_5 = arith.constant 0 : index
    %c0_6 = arith.constant 0 : index
    %6 = vector.load %arg4[%c0_5, %c0_6] : memref<512x32xf32, #tpu.memory_space<vmem>>, vector<512x32xf32>
    tpu.vector_store %arg4[%c0_5, %c0_6], %5 {strides = array<i32>} : memref<512x32xf32, #tpu.memory_space<vmem>>, vector<512x32xf32>,
    return
  }
  func.func @transform_0(%arg0: i32) -> (i32, i32) {
    %c0_i32 = arith.constant 0 : i32
    %c0_i32_0 = arith.constant 0 : i32
    return %arg0, %c0_i32 : i32, i32
  }
  func.func @transform_1(%arg0: i32) -> (i32, i32) {
    %c0_i32 = arith.constant 0 : i32
    %c0_i32_0 = arith.constant 0 : i32
    %c0_i32_1 = arith.constant 0 : i32
    return %c0_i32, %c0_i32_0 : i32, i32
  }
  func.func @transform_2(%arg0: i32) -> (i32, i32) {
    %c0_i32 = arith.constant 0 : i32
    %c0_i32_0 = arith.constant 0 : i32
    %c0_i32_1 = arith.constant 0 : i32
    return %c0_i32, %c0_i32_0 : i32, i32
  }
  func.func @transform_3(%arg0: i32) -> (i32, i32) {
    %c0_i32 = arith.constant 0 : i32
    %c0_i32_0 = arith.constant 0 : i32
    return %arg0, %c0_i32 : i32, i32
  }
}

</mosaic_0001>

<bundles_post_ra>
// kernel: tpu_custom_call.1
= control target key start
LH: loop header
LB: loop body
LE: loop exit
PB: predicated region body
PF: predicated region fallthrough
CT: control target
= control target key end

     0   :  { %8 = vsyncpa [#allocation3], 0  ;;  %s2212_s0 = inlined_call_operand.hbm [shape: bf16[1024,256], index: 0, kind: input, shape index: {}]   ;;  %s2213_s1 = inlined_call_operand.vmem [shape: bf16[256,32], index: 1, kind: input, shape index: {}]   ;;  %s2214_s2 = inlined_call_operand.vmem [shape: f32[1,32], index: 2, kind: input, shape index: {}]   ;;  %s2215_s3 = inlined_call_operand.vmem [shape: f32[1024,32], index: 3, kind: output, shape index: {}]  }
   0x1   :  { %10 = vsyncpa [#allocation3 + $0x1], 0  ;;  %s1744_s12 = smov 0   ;;  %s1746_s13 = smov 0  }
   0x2   :  { %s1748_s14 = smov 0   ;;  %s1750_s15 = smov 0  }
   0x3 LB: > { %s1182_s16 = sadd.s32 4294967295, %s1720_s15   ;;  %s1764_s17 = sadd.s32 1, %s1720_s15   ;;  %s1720_s15 = sphi %s1750_s15, %s2222_s15   ;;  %s1716_s14 = sphi %s1748_s14, %s2221_s14   ;;  %s1712_s13 = sphi %s1746_s13, %s2220_s13   ;;  %s1708_s12 = sphi %s1744_s12, %s2219_s12  }
   0x4   : > { %s20_s18 = ssub.s32 %s1720_s15, %s1764_s17  ;;  %s23_s19 = sadd.s32 1, %s1716_s14 }
   0x5   : > { %p21_p0 = scmp.eq.s32.totalorder %s20_s18, 0  ;;  %p30_p1 = scmp.ne.s32.totalorder %s1716_s14, %s1712_s13 }
   0x6   : > { %p31_p2 = scmp.eq.s32.totalorder %s1720_s15, 0  ;;  %p36_p3 = scmp.ne.s32.totalorder %s1712_s13, %s1708_s12 }
   0x7   : > { %s1774_s20 = scalar_select %p21_p0, %s1716_s14, %s23_s19  }
   0x8   : > { %p1776_p4 = por %p31_p2, %p30_p1  ;;  %p37_p5 = scmp.eq.s32.totalorder %s1182_s16, 0 }
   0x9   : > { %p1620_p6 = scmp.lt.s32.totalorder %s1720_s15, 2  ;;  %s134_s23 = sand.u32 1, %s1716_s14  }
   0xa   : > { %p1783_p7 = por %p37_p5, %p36_p3  ;;  %s1186_s24 = sshll.u32 %s134_s23, 9 }
   0xb   : > { %s1517_s25 = sshll.u32 %s1720_s15, 9  ;;  %s138_s29 = scalar_lea.vmem [#allocation2], %s1186_s24 }
   0xc   : > { %s144_s28 = scalar_lea.hbm %s2212_s0, %s1517_s25  ;;  %s147_s30 = sshll.u32 %s138_s29, 4  ;;  %s148_s30 = int_to_ptr.vmem [resolvable:$true] %s147_s30 }
   0xd   : > { %s145_s4 = sshll.u32 %s144_s28, 4  ;;  %p1794_p8 = pnand %p1620_p6, %p1776_p4  ;;  %s146_s4 = int_to_ptr.hbm [resolvable:$true] %s145_s4 }
   0xe   : > { %p1190_p9 = scmp.ge.s32.totalorder %s1720_s15, 1  ;;  %s135_s6 = scalar_lea.sflag [#allocation3], %s134_s23 }
   0xf   : > { %s1656_s7 = sshra.s32 %s146_s4, 4  ;;  %p1660_p11 = pneg %p1794_p8  ;;  %s1657_s7 = int_to_ptr.hbm [resolvable:$true] %s1656_s7 }
  0x10   : > { %s1658_s8 = scalar_lea.hbm %s1657_s7, 512  ;;  %s1663_s11 = scalar_lea.hbm %s2212_s0, 1024 }
  0x11   : > { %p1659_p10 = scmp.ne.s32.totalorder %s1657_s7, %s1658_s8  ;;  %p1664_p0 = scmp.lt.s32.totalorder %s1657_s7, %s2212_s0 }
  0x12   : > { %p1665_p1 = scmp.lt.s32.totalorder %s1663_s11, %s1658_s8 }
  0x13   : > { %p1661_p12 = pnand %p1660_p11, %p1659_p10 }
  0x14   : > { %p1666_p2 = por %p1665_p1, %p1664_p0 }
  0x15   : > { %p1662_p13 = pneg %p1661_p12 }
  0x17   : > { %p1667_p3 = pnand %p1666_p2, %p1662_p13 }
  0x19   : > { %1670 = shalt.err (!%p1667_p3)
}
  0x1a   : > { %s1722_s19 = smov 128   ;;  %s1723_s21 = smov 8  }
  0x1b   : > { %1619 = dma.hbm_to_vmem [thread:$0]  (!%p1794_p8), %s146_s4, 8192, %s148_s30, %s135_s6, %s1722_s19, %s1722_s19, %s1723_s21  }
  0x1c   : > { %p155_p4 = scmp.lt.s32.totalorder %s1720_s15, 3 }
  0x1e   : > { %p156_p5 = pnand %p1190_p9, %p155_p4 }
  0x1f   : > { %s161_s23 = sand.u32 (!%p156_p5), 1, %s1712_s13  }
  0x20   : > { %159 = sbr.rel (%p156_p5) target bundleno = 455 (0x1c7), region = 32  ;;  %s1191_s24 = sshll.u32 (!%p156_p5), %s161_s23, 9 }
  0x21   : > { %s162_s25 = scalar_lea.sflag (!%p156_p5), [#allocation3], %s161_s23  ;;  %s1813_s26 = scalar_lea.vmem (!%p156_p5), [#allocation2], %s1191_s24 }
  0x25   : > { %1703 = dma.done.wait (%p1783_p7), %s162_s25, 8192  }
  0x26   : > { %1705 = vsyncadd (%p1783_p7), %s162_s25, 4294959104  ;;  %v1589_v0 = vld [vmem:[%s2213_s1 + $0x38] sm:$0xff]  ;;  %v1588_v2 = vld [vmem:[%s2213_s1 + $0x30] sm:$0xff]  ;;  %s1192_s11 = sshll.u32 %s1182_s16, 6  ;;  %vm1050_vm0 = vcmask 261120  }
  0x27   : > { %v1597_v1 = vld [vmem:[%s2213_s1 + $0x78] sm:$0xff]  ;;  %712 = vmatpush.bf16.msra.mxu0 %v1589_v0  ;;  %1598 = vmatpush.bf16.msra.mxu2 %v1589_v0  ;;  %v1596_v3 = vld [vmem:[%s2213_s1 + $0x70] sm:$0xff]  ;;  %v1587_v4 = vld [vmem:[%s2213_s1 + $0x28] sm:$0xff]  ;;  %p191_p6 = scmp.lt.s32.totalorder %s1192_s11, 127 }
  0x28   : > { %881 = vmatpush.bf16.msra.mxu1 %v1597_v1  ;;  %1606 = vmatpush.bf16.msra.mxu3 %v1597_v1  ;;  %v1595_v5 = vld [vmem:[%s2213_s1 + $0x68] sm:$0xff]  ;;  %v1586_v6 = vld [vmem:[%s2213_s1 + $0x20] sm:$0xff]  ;;  %v1585_v8 = vld [vmem:[%s2213_s1 + $0x18] sm:$0xff] }
  0x29   : > { %v1594_v7 = vld [vmem:[%s2213_s1 + $0x60] sm:$0xff]  ;;  %v1593_v9 = vld [vmem:[%s2213_s1 + $0x58] sm:$0xff]  ;;  %v1584_v10 = vld [vmem:[%s2213_s1 + $0x10] sm:$0xff]  ;;  %s2224_s11 = smov (!%p191_p6, %s1192_s11), 127 }
  0x2a   : > { %v1592_v11 = vld [vmem:[%s2213_s1 + $0x50] sm:$0xff]  ;;  %v1583_v12 = vld [vmem:[%s2213_s1 + $0x8] sm:$0xff]  ;;  %v1582_v14 = vld [vmem:[%s2213_s1] sm:$0xff]  ;;  %s1193_s19 = sshll.u32 %s2224_s11, 3 }
  0x2b   : > { %713 = vmatpush.bf16.msra.mxu0 %v1588_v2  ;;  %1599 = vmatpush.bf16.msra.mxu2 %v1588_v2  ;;  %v1591_v13 = vld [vmem:[%s2213_s1 + $0x48] sm:$0xff]  ;;  %v1590_v15 = vld [vmem:[%s2213_s1 + $0x40] sm:$0xff]  ;;  %v1204_v28 = vld [vmem:[%s1813_s26 + $0x10] sm:$0xf]  ;;  %s1950_s21 = scalar_lea.vmem %s2215_s3, %s1193_s19 }
  0x2c   : > { %882 = vmatpush.bf16.msra.mxu1 %v1596_v3  ;;  %1607 = vmatpush.bf16.msra.mxu3 %v1596_v3  ;;  %v1196_v16 = vld [vmem:[%s1813_s26] sm:$0xf]  ;;  %v1519_v17 = vld [vmem:[%s1813_s26 + $0x4] sm:$0xf0]  ;;  %v1518_v20 = vld [vmem:[%s1813_s26 + $0x4] sm:$0xf] }
  0x2d   : > { %v1324_v18 = vld [vmem:[%s1813_s26 + $0x100] sm:$0xf]  ;;  %v1551_v19 = vld [vmem:[%s1813_s26 + $0x104] sm:$0xf0]  ;;  %v1198_v21 = vld [vmem:[%s1813_s26 + $0x8] sm:$0xf0]  ;;  %v1197_v24 = vor.u32 %v1519_v17, %v1196_v16 }
  0x2e   : > { %v1550_v22 = vld [vmem:[%s1813_s26 + $0x104] sm:$0xf]  ;;  %v1326_v23 = vld [vmem:[%s1813_s26 + $0x108] sm:$0xf0]  ;;  %v1325_v25 = vor.u32 %v1551_v19, %v1324_v18  ;;  %v1201_v26 = vor.u32 %v1518_v20, %v1198_v21  ;;  %v1521_v29 = vld [vmem:[%s1813_s26 + $0x14] sm:$0xf0] }
  0x2f   : > { %714 = vmatpush.bf16.msra.mxu0 %v1587_v4  ;;  %1600 = vmatpush.bf16.msra.mxu2 %v1587_v4  ;;  %v1329_v27 = vor.u32 %v1550_v22, %v1326_v23  ;;  %v1332_v30 = vld [vmem:[%s1813_s26 + $0x110] sm:$0xf]  ;;  %v1553_v31 = vld [vmem:[%s1813_s26 + $0x114] sm:$0xf0]  ;;  %v1520_v32 = vld [vmem:[%s1813_s26 + $0x14] sm:$0xf]  ;;  %v1205_v36 = vor.u32 %v1521_v29, %v1204_v28 }
  0x30   : > { %883 = vmatpush.bf16.msra.mxu1 %v1595_v5  ;;  %1608 = vmatpush.bf16.msra.mxu3 %v1595_v5  ;;  %v1206_v33 = vld [vmem:[%s1813_s26 + $0x18] sm:$0xf0]  ;;  %v1552_v34 = vld [vmem:[%s1813_s26 + $0x114] sm:$0xf]  ;;  %v1333_v37 = vor.u32 %v1553_v31, %v1332_v30  ;;  %v1212_v40 = vld [vmem:[%s1813_s26 + $0x20] sm:$0xf] }
  0x31   : > { %v1334_v35 = vld [vmem:[%s1813_s26 + $0x118] sm:$0xf0]  ;;  %v1209_v38 = vor.u32 %v1520_v32, %v1206_v33  ;;  %v1523_v41 = vld [vmem:[%s1813_s26 + $0x24] sm:$0xf0]  ;;  %v1340_v42 = vld [vmem:[%s1813_s26 + $0x120] sm:$0xf] }
  0x32   : > { %v1337_v39 = vor.u32 %v1552_v34, %v1334_v35  ;;  %v1555_v43 = vld [vmem:[%s1813_s26 + $0x124] sm:$0xf0]  ;;  %v1522_v44 = vld [vmem:[%s1813_s26 + $0x24] sm:$0xf]  ;;  %v1214_v45 = vld [vmem:[%s1813_s26 + $0x28] sm:$0xf0]  ;;  %v1213_v48 = vor.u32 %v1523_v41, %v1212_v40 }
  0x33   : > { %715 = vmatpush.bf16.msra.mxu0 %v1586_v6  ;;  %1601 = vmatpush.bf16.msra.mxu2 %v1586_v6  ;;  %v1554_v46 = vld [vmem:[%s1813_s26 + $0x124] sm:$0xf]  ;;  %v1342_v47 = vld [vmem:[%s1813_s26 + $0x128] sm:$0xf0]  ;;  %v1341_v49 = vor.u32 %v1555_v43, %v1340_v42  ;;  %v1217_v50 = vor.u32 %v1522_v44, %v1214_v45  ;;  %v1220_v52 = vld [vmem:[%s1813_s26 + $0x30] sm:$0xf] }
  0x34   : > { %884 = vmatpush.bf16.msra.mxu1 %v1594_v7  ;;  %1609 = vmatpush.bf16.msra.mxu3 %v1594_v7  ;;  %v1345_v51 = vor.u32 %v1554_v46, %v1342_v47  ;;  %v1525_v53 = vld [vmem:[%s1813_s26 + $0x34] sm:$0xf0]  ;;  %v1348_v54 = vld [vmem:[%s1813_s26 + $0x130] sm:$0xf]  ;;  %v1524_v56 = vld [vmem:[%s1813_s26 + $0x34] sm:$0xf] }
  0x35   : > { %v1557_v55 = vld [vmem:[%s1813_s26 + $0x134] sm:$0xf0]  ;;  %v1222_v57 = vld [vmem:[%s1813_s26 + $0x38] sm:$0xf0]  ;;  %v1556_v58 = vld [vmem:[%s1813_s26 + $0x134] sm:$0xf]  ;;  %v1221_v60 = vor.u32 %v1525_v53, %v1220_v52 }
  0x36   : > { %v1350_v59 = vld [vmem:[%s1813_s26 + $0x138] sm:$0xf0]  ;;  %v1349_v61 = vor.u32 %v1557_v55, %v1348_v54  ;;  %v1225_v62 = vor.u32 %v1524_v56, %v1222_v57  ;;  %v1228_v0 = vld [vmem:[%s1813_s26 + $0x40] sm:$0xf]  ;;  %v1527_v1 = vld [vmem:[%s1813_s26 + $0x44] sm:$0xf0] }
  0x37   : > { %716 = vmatpush.bf16.msra.mxu0 %v1585_v8  ;;  %1602 = vmatpush.bf16.msra.mxu2 %v1585_v8  ;;  %v1353_v63 = vor.u32 %v1556_v58, %v1350_v59  ;;  %v1356_v2 = vld [vmem:[%s1813_s26 + $0x140] sm:$0xf]  ;;  %v1559_v3 = vld [vmem:[%s1813_s26 + $0x144] sm:$0xf0]  ;;  %v1526_v4 = vld [vmem:[%s1813_s26 + $0x44] sm:$0xf]  ;;  %v1229_v8 = vor.u32 %v1527_v1, %v1228_v0 }
  0x38   : > { %885 = vmatpush.bf16.msra.mxu1 %v1593_v9  ;;  %1610 = vmatpush.bf16.msra.mxu3 %v1593_v9  ;;  %v1230_v5 = vld [vmem:[%s1813_s26 + $0x48] sm:$0xf0]  ;;  %v1558_v6 = vld [vmem:[%s1813_s26 + $0x144] sm:$0xf]  ;;  %v1357_v9 = vor.u32 %v1559_v3, %v1356_v2  ;;  %v1528_v16 = vld [vmem:[%s1813_s26 + $0x54] sm:$0xf] }
  0x39   : > { %v1358_v7 = vld [vmem:[%s1813_s26 + $0x148] sm:$0xf0]  ;;  %v1238_v17 = vld [vmem:[%s1813_s26 + $0x58] sm:$0xf0]  ;;  %v1560_v18 = vld [vmem:[%s1813_s26 + $0x154] sm:$0xf] }
  0x3a   : > { %v1366_v19 = vld [vmem:[%s1813_s26 + $0x158] sm:$0xf0]  ;;  %v1241_v22 = vor.u32 %v1528_v16, %v1238_v17  ;;  %v1530_v28 = vld [vmem:[%s1813_s26 + $0x64] sm:$0xf]  ;;  %v1246_v29 = vld [vmem:[%s1813_s26 + $0x68] sm:$0xf0] }
  0x3b   : > { %717 = vmatpush.bf16.msra.mxu0 %v1584_v10  ;;  %1603 = vmatpush.bf16.msra.mxu2 %v1584_v10  ;;  %v1233_v10 = vor.u32 %v1526_v4, %v1230_v5  ;;  %v1369_v23 = vor.u32 %v1560_v18, %v1366_v19  ;;  %v1562_v30 = vld [vmem:[%s1813_s26 + $0x164] sm:$0xf]  ;;  %v1374_v31 = vld [vmem:[%s1813_s26 + $0x168] sm:$0xf0]  ;;  %v1249_v34 = vor.u32 %v1530_v28, %v1246_v29  ;;  %v1532_v40 = vld [vmem:[%s1813_s26 + $0x74] sm:$0xf] }
  0x3c   : > { %886 = vmatpush.bf16.msra.mxu1 %v1592_v11  ;;  %1611 = vmatpush.bf16.msra.mxu3 %v1592_v11  ;;  %v1361_v11 = vor.u32 %v1558_v6, %v1358_v7  ;;  %v1377_v35 = vor.u32 %v1562_v30, %v1374_v31  ;;  %v1254_v41 = vld [vmem:[%s1813_s26 + $0x78] sm:$0xf0]  ;;  %v1564_v42 = vld [vmem:[%s1813_s26 + $0x174] sm:$0xf]  ;;  %v1567_v52 = vld [vmem:[%s1813_s26 + $0x184] sm:$0xf0] }
  0x3d   : > { %v1382_v43 = vld [vmem:[%s1813_s26 + $0x178] sm:$0xf0]  ;;  %v1257_v46 = vor.u32 %v1532_v40, %v1254_v41  ;;  %v1534_v53 = vld [vmem:[%s1813_s26 + $0x84] sm:$0xf]  ;;  %v1262_v54 = vld [vmem:[%s1813_s26 + $0x88] sm:$0xf0] }
  0x3e   : > { %v1385_v47 = vor.u32 %v1564_v42, %v1382_v43  ;;  %v1566_v55 = vld [vmem:[%s1813_s26 + $0x184] sm:$0xf]  ;;  %v1390_v56 = vld [vmem:[%s1813_s26 + $0x188] sm:$0xf0]  ;;  %v1398_v16 = vld [vmem:[%s1813_s26 + $0x198] sm:$0xf0] }
  0x3f   : > { %718 = vmatpush.bf16.msra.mxu0 %v1583_v12  ;;  %1604 = vmatpush.bf16.msra.mxu2 %v1583_v12  ;;  %v1236_v12 = vld [vmem:[%s1813_s26 + $0x50] sm:$0xf]  ;;  %v1571_v40 = vld [vmem:[%s1813_s26 + $0x1a4] sm:$0xf0]  ;;  %v1538_v41 = vld [vmem:[%s1813_s26 + $0xa4] sm:$0xf] }
  0x40   : > { %887 = vmatpush.bf16.msra.mxu1 %v1591_v13  ;;  %1612 = vmatpush.bf16.msra.mxu3 %v1591_v13  ;;  %v1529_v13 = vld [vmem:[%s1813_s26 + $0x54] sm:$0xf0]  ;;  %v1278_v42 = vld [vmem:[%s1813_s26 + $0xa8] sm:$0xf0]  ;;  %v1570_v43 = vld [vmem:[%s1813_s26 + $0x1a4] sm:$0xf] }
  0x41   : > { %v1237_v20 = vor.u32 %v1529_v13, %v1236_v12  ;;  %v1569_v12 = vld [vmem:[%s1813_s26 + $0x194] sm:$0xf0]  ;;  %v1536_v13 = vld [vmem:[%s1813_s26 + $0x94] sm:$0xf] }
  0x43   : > { %719 = vmatpush.bf16.msra.mxu0 %v1582_v14  ;;  %1605 = vmatpush.bf16.msra.mxu2 %v1582_v14  ;;  %v1364_v14 = vld [vmem:[%s1813_s26 + $0x150] sm:$0xf] }
  0x44   : > { %888 = vmatpush.bf16.msra.mxu1 %v1590_v15  ;;  %1613 = vmatpush.bf16.msra.mxu3 %v1590_v15  ;;  %v1561_v15 = vld [vmem:[%s1813_s26 + $0x154] sm:$0xf0] }
  0x45   : > { %v1365_v21 = vor.u32 %v1561_v15, %v1364_v14  ;;  %v1270_v14 = vld [vmem:[%s1813_s26 + $0x98] sm:$0xf0]  ;;  %v1568_v15 = vld [vmem:[%s1813_s26 + $0x194] sm:$0xf] }
  0x46   : > { %720 = vmatmul.bf16.vlgmr.msra.gmra.mxu0 %v1197_v24  ;;  %800 = vmatmul.bf16.vlgmr.msra.gmra.mxu2 %v1325_v25  ;;  %v1244_v24 = vld [vmem:[%s1813_s26 + $0x60] sm:$0xf]  ;;  %v1531_v25 = vld [vmem:[%s1813_s26 + $0x64] sm:$0xf0] }
  0x47   : > { %889 = vmatmul.bf16.vlgmr.msra.gmra.mxu1 %v1201_v26  ;;  %969 = vmatmul.bf16.vlgmr.msra.gmra.mxu3 %v1329_v27  ;;  %v1372_v26 = vld [vmem:[%s1813_s26 + $0x160] sm:$0xf]  ;;  %v1563_v27 = vld [vmem:[%s1813_s26 + $0x164] sm:$0xf0]  ;;  %v1245_v32 = vor.u32 %v1531_v25, %v1244_v24  ;;  %v1401_v24 = vor.u32 %v1568_v15, %v1398_v16 }
  0x48   : > { %v1373_v33 = vor.u32 %v1563_v27, %v1372_v26 }
  0x56   : > { %725 = vmatmul.bf16.gmra.mxu0 %v1205_v36  ;;  %805 = vmatmul.bf16.gmra.mxu2 %v1333_v37  ;;  %v1252_v36 = vld [vmem:[%s1813_s26 + $0x70] sm:$0xf]  ;;  %v1533_v37 = vld [vmem:[%s1813_s26 + $0x74] sm:$0xf0] }
  0x57   : > { %894 = vmatmul.bf16.gmra.mxu1 %v1209_v38  ;;  %974 = vmatmul.bf16.gmra.mxu3 %v1337_v39  ;;  %v1380_v38 = vld [vmem:[%s1813_s26 + $0x170] sm:$0xf]  ;;  %v1565_v39 = vld [vmem:[%s1813_s26 + $0x174] sm:$0xf0]  ;;  %v1253_v44 = vor.u32 %v1533_v37, %v1252_v36  ;;  %v1276_v36 = vld [vmem:[%s1813_s26 + $0xa0] sm:$0xf] }
  0x58   : > { %v1381_v45 = vor.u32 %v1565_v39, %v1380_v38  ;;  %v1539_v38 = vld [vmem:[%s1813_s26 + $0xa4] sm:$0xf0]  ;;  %v1404_v39 = vld [vmem:[%s1813_s26 + $0x1a0] sm:$0xf] }
  0x66   : > { %730 = vmatmul.bf16.gmra.mxu0 %v1213_v48  ;;  %810 = vmatmul.bf16.gmra.mxu2 %v1341_v49  ;;  %v1936_v48 = vld [vmem:[%s2214_s2] ss:$0 sm:$0xff] }
  0x67   : > { %899 = vmatmul.bf16.gmra.mxu1 %v1217_v50  ;;  %979 = vmatmul.bf16.gmra.mxu3 %v1345_v51  ;;  %v1260_v49 = vld [vmem:[%s1813_s26 + $0x80] sm:$0xf]  ;;  %v1535_v50 = vld [vmem:[%s1813_s26 + $0x84] sm:$0xf0] }
  0x68   : > { %v1388_v51 = vld [vmem:[%s1813_s26 + $0x180] sm:$0xf]  ;;  %v1261_v57 = vor.u32 %v1535_v50, %v1260_v49  ;;  %v1277_v49 = vor.u32 %v1539_v38, %v1276_v36  ;;  %v1405_v50 = vor.u32 %v1571_v40, %v1404_v39  ;;  %v1574_v36 = vld [vmem:[%s1813_s26 + $0x1c4] sm:$0xf] }
  0x69   : > { %v1389_v58 = vor.u32 %v1567_v52, %v1388_v51  ;;  %v1281_v52 = vor.u32 %v1538_v41, %v1278_v42 }
  0x76   : > { %735 = vmatmul.bf16.gmra.mxu0 %v1221_v60  ;;  %815 = vmatmul.bf16.gmra.mxu2 %v1349_v61  ;;  %v1265_v60 = vor.u32 %v1534_v53, %v1262_v54  ;;  %v1393_v61 = vor.u32 %v1566_v55, %v1390_v56 }
  0x77   : > { %904 = vmatmul.bf16.gmra.mxu1 %v1225_v62  ;;  %984 = vmatmul.bf16.gmra.mxu3 %v1353_v63 }
  0x86   : > { %740 = vmatmul.bf16.gmra.mxu0 %v1229_v8  ;;  %820 = vmatmul.bf16.gmra.mxu2 %v1357_v9  ;;  %v1268_v8 = vld [vmem:[%s1813_s26 + $0x90] sm:$0xf] }
  0x87   : > { %909 = vmatmul.bf16.gmra.mxu1 %v1233_v10  ;;  %989 = vmatmul.bf16.gmra.mxu3 %v1361_v11  ;;  %v1537_v10 = vld [vmem:[%s1813_s26 + $0x94] sm:$0xf0]  ;;  %v1396_v11 = vld [vmem:[%s1813_s26 + $0x190] sm:$0xf] }
  0x96   : > { %745 = vmatmul.bf16.gmra.mxu0 %v1237_v20  ;;  %825 = vmatmul.bf16.gmra.mxu2 %v1365_v21  ;;  %v1269_v20 = vor.u32 %v1537_v10, %v1268_v8  ;;  %v1397_v21 = vor.u32 %v1569_v12, %v1396_v11  ;;  %v1572_v8 = vld [vmem:[%s1813_s26 + $0x1b4] sm:$0xf] }
  0x97   : > { %914 = vmatmul.bf16.gmra.mxu1 %v1241_v22  ;;  %994 = vmatmul.bf16.gmra.mxu3 %v1369_v23  ;;  %v1273_v23 = vor.u32 %v1536_v13, %v1270_v14 }
  0xa6   : > { %750 = vmatmul.bf16.gmra.mxu0 %v1245_v32  ;;  %830 = vmatmul.bf16.gmra.mxu2 %v1373_v33 }
  0xa7   : > { %919 = vmatmul.bf16.gmra.mxu1 %v1249_v34  ;;  %999 = vmatmul.bf16.gmra.mxu3 %v1377_v35 }
  0xb6   : > { %755 = vmatmul.bf16.gmra.mxu0 %v1253_v44  ;;  %835 = vmatmul.bf16.gmra.mxu2 %v1381_v45  ;;  %v1406_v44 = vld [vmem:[%s1813_s26 + $0x1a8] sm:$0xf0] }
  0xb7   : > { %924 = vmatmul.bf16.gmra.mxu1 %v1257_v46  ;;  %1004 = vmatmul.bf16.gmra.mxu3 %v1385_v47  ;;  %v1409_v53 = vor.u32 %v1570_v43, %v1406_v44 }
  0xc3   : > { %v721_v59 = vpop.f32.mrf.mxu0 }
  0xc4   : > { %v722_v62 = vadd.f32 %v1936_v48, %v721_v59  ;;  %v890_v63 = vpop.f32.mrf.mxu1 }
  0xc6   : > { %v891_v0 = vadd.f32 %v890_v63, %v722_v62  ;;  %760 = vmatmul.bf16.gmra.mxu0 %v1261_v57  ;;  %840 = vmatmul.bf16.gmra.mxu2 %v1389_v58 }
  0xc7   : > { %929 = vmatmul.bf16.gmra.mxu1 %v1265_v60  ;;  %1009 = vmatmul.bf16.gmra.mxu3 %v1393_v61 }
  0xc8   : > { %1051 = vst.msk [vmem:[%s1950_s21] sm:$0xff] %vm1050_vm0, %v891_v0 }
  0xc9   : > { %v801_v1 = vpop.f32.mrf.mxu2 }
  0xca   : > { %v802_v2 = vadd.f32 %v1936_v48, %v801_v1  ;;  %v970_v3 = vpop.f32.mrf.mxu3  ;;  %v1284_v1 = vld [vmem:[%s1813_s26 + $0xb0] sm:$0xf] }
  0xcb   : > { %v723_v4 = vpop.f32.mrf.mxu0 }
  0xcc   : > { %v971_v5 = vadd.f32 %v970_v3, %v802_v2  ;;  %v724_v6 = vadd.f32 %v1936_v48, %v723_v4  ;;  %v892_v7 = vpop.f32.mrf.mxu1  ;;  %v1541_v3 = vld [vmem:[%s1813_s26 + $0xb4] sm:$0xf0]  ;;  %v1412_v4 = vld [vmem:[%s1813_s26 + $0x1b0] sm:$0xf] }
  0xcd   : > { %v1285_v13 = vor.u32 %v1541_v3, %v1284_v1  ;;  %v1576_v1 = vld [vmem:[%s1813_s26 + $0x1d4] sm:$0xf] }
  0xce   : > { %1083 = vst.msk [vmem:[%s1950_s21 + $0x100] sm:$0xff] %vm1050_vm0, %v971_v5  ;;  %v893_v9 = vadd.f32 %v892_v7, %v724_v6  ;;  %v1573_v5 = vld [vmem:[%s1813_s26 + $0x1b4] sm:$0xf0]  ;;  %v1540_v6 = vld [vmem:[%s1813_s26 + $0xb4] sm:$0xf] }
  0xcf   : > { %v1286_v7 = vld [vmem:[%s1813_s26 + $0xb8] sm:$0xf0]  ;;  %v1413_v14 = vor.u32 %v1573_v5, %v1412_v4 }
  0xd0   : > { %1052 = vst.msk [vmem:[%s1950_s21 + $0x8] sm:$0xff] %vm1050_vm0, %v893_v9  ;;  %v1414_v9 = vld [vmem:[%s1813_s26 + $0x1b8] sm:$0xf0]  ;;  %v1289_v16 = vor.u32 %v1540_v6, %v1286_v7 }
  0xd1   : > { %v803_v17 = vpop.f32.mrf.mxu2 }
  0xd2   : > { %v804_v18 = vadd.f32 %v1936_v48, %v803_v17  ;;  %v972_v19 = vpop.f32.mrf.mxu3  ;;  %v1417_v17 = vor.u32 %v1572_v8, %v1414_v9 }
  0xd3   : > { %v726_v22 = vpop.f32.mrf.mxu0 }
  0xd4   : > { %v973_v25 = vadd.f32 %v972_v19, %v804_v18  ;;  %v727_v26 = vadd.f32 %v1936_v48, %v726_v22  ;;  %v895_v27 = vpop.f32.mrf.mxu1 }
  0xd6   : > { %1084 = vst.msk [vmem:[%s1950_s21 + $0x108] sm:$0xff] %vm1050_vm0, %v973_v25  ;;  %v896_v28 = vadd.f32 %v895_v27, %v727_v26  ;;  %765 = vmatmul.bf16.gmra.mxu0 %v1269_v20  ;;  %845 = vmatmul.bf16.gmra.mxu2 %v1397_v21 }
  0xd7   : > { %934 = vmatmul.bf16.gmra.mxu1 %v1273_v23  ;;  %1014 = vmatmul.bf16.gmra.mxu3 %v1401_v24 }
  0xd8   : > { %1053 = vst.msk [vmem:[%s1950_s21 + $0x10] sm:$0xff] %vm1050_vm0, %v896_v28 }
  0xd9   : > { %v806_v29 = vpop.f32.mrf.mxu2 }
  0xda   : > { %v807_v30 = vadd.f32 %v1936_v48, %v806_v29  ;;  %v975_v31 = vpop.f32.mrf.mxu3  ;;  %v1292_v29 = vld [vmem:[%s1813_s26 + $0xc0] sm:$0xf] }
  0xdb   : > { %v728_v32 = vpop.f32.mrf.mxu0 }
  0xdc   : > { %v976_v33 = vadd.f32 %v975_v31, %v807_v30  ;;  %v729_v34 = vadd.f32 %v1936_v48, %v728_v32  ;;  %v897_v35 = vpop.f32.mrf.mxu1  ;;  %v1543_v31 = vld [vmem:[%s1813_s26 + $0xc4] sm:$0xf0]  ;;  %v1420_v32 = vld [vmem:[%s1813_s26 + $0x1c0] sm:$0xf] }
  0xdd   : > { %v1293_v41 = vor.u32 %v1543_v31, %v1292_v29  ;;  %v1578_v29 = vld [vmem:[%s1813_s26 + $0x1e4] sm:$0xf] }
  0xde   : > { %1085 = vst.msk [vmem:[%s1950_s21 + $0x110] sm:$0xff] %vm1050_vm0, %v976_v33  ;;  %v898_v37 = vadd.f32 %v897_v35, %v729_v34  ;;  %v1575_v33 = vld [vmem:[%s1813_s26 + $0x1c4] sm:$0xf0]  ;;  %v1542_v34 = vld [vmem:[%s1813_s26 + $0xc4] sm:$0xf] }
  0xdf   : > { %v1294_v35 = vld [vmem:[%s1813_s26 + $0xc8] sm:$0xf0]  ;;  %v1421_v42 = vor.u32 %v1575_v33, %v1420_v32 }
  0xe0   : > { %1054 = vst.msk [vmem:[%s1950_s21 + $0x18] sm:$0xff] %vm1050_vm0, %v898_v37  ;;  %v1422_v37 = vld [vmem:[%s1813_s26 + $0x1c8] sm:$0xf0]  ;;  %v1297_v44 = vor.u32 %v1542_v34, %v1294_v35 }
  0xe1   : > { %v808_v45 = vpop.f32.mrf.mxu2 }
  0xe2   : > { %v809_v46 = vadd.f32 %v1936_v48, %v808_v45  ;;  %v977_v47 = vpop.f32.mrf.mxu3  ;;  %v1425_v45 = vor.u32 %v1574_v36, %v1422_v37 }
  0xe3   : > { %v731_v51 = vpop.f32.mrf.mxu0 }
  0xe4   : > { %v978_v54 = vadd.f32 %v977_v47, %v809_v46  ;;  %v732_v55 = vadd.f32 %v1936_v48, %v731_v51  ;;  %v900_v56 = vpop.f32.mrf.mxu1 }
  0xe6   : > { %1086 = vst.msk [vmem:[%s1950_s21 + $0x118] sm:$0xff] %vm1050_vm0, %v978_v54  ;;  %v901_v57 = vadd.f32 %v900_v56, %v732_v55  ;;  %770 = vmatmul.bf16.gmra.mxu0 %v1277_v49  ;;  %850 = vmatmul.bf16.gmra.mxu2 %v1405_v50 }
  0xe7   : > { %939 = vmatmul.bf16.gmra.mxu1 %v1281_v52  ;;  %1019 = vmatmul.bf16.gmra.mxu3 %v1409_v53 }
  0xe8   : > { %1055 = vst.msk [vmem:[%s1950_s21 + $0x20] sm:$0xff] %vm1050_vm0, %v901_v57 }
  0xe9   : > { %v811_v58 = vpop.f32.mrf.mxu2 }
  0xea   : > { %v812_v59 = vadd.f32 %v1936_v48, %v811_v58  ;;  %v980_v60 = vpop.f32.mrf.mxu3  ;;  %v1300_v58 = vld [vmem:[%s1813_s26 + $0xd0] sm:$0xf] }
  0xeb   : > { %v733_v61 = vpop.f32.mrf.mxu0 }
  0xec   : > { %v981_v62 = vadd.f32 %v980_v60, %v812_v59  ;;  %v734_v63 = vadd.f32 %v1936_v48, %v733_v61  ;;  %v902_v0 = vpop.f32.mrf.mxu1  ;;  %v1545_v60 = vld [vmem:[%s1813_s26 + $0xd4] sm:$0xf0]  ;;  %v1428_v61 = vld [vmem:[%s1813_s26 + $0x1d0] sm:$0xf] }
  0xed   : > { %v1301_v6 = vor.u32 %v1545_v60, %v1300_v58  ;;  %v1580_v58 = vld [vmem:[%s1813_s26 + $0x1f4] sm:$0xf] }
  0xee   : > { %1087 = vst.msk [vmem:[%s1950_s21 + $0x120] sm:$0xff] %vm1050_vm0, %v981_v62  ;;  %v903_v2 = vadd.f32 %v902_v0, %v734_v63  ;;  %v1577_v62 = vld [vmem:[%s1813_s26 + $0x1d4] sm:$0xf0]  ;;  %v1544_v63 = vld [vmem:[%s1813_s26 + $0xd4] sm:$0xf] }
  0xef   : > { %v1302_v0 = vld [vmem:[%s1813_s26 + $0xd8] sm:$0xf0]  ;;  %v1429_v7 = vor.u32 %v1577_v62, %v1428_v61 }
  0xf0   : > { %1056 = vst.msk [vmem:[%s1950_s21 + $0x28] sm:$0xff] %vm1050_vm0, %v903_v2  ;;  %v1430_v2 = vld [vmem:[%s1813_s26 + $0x1d8] sm:$0xf0]  ;;  %v1305_v9 = vor.u32 %v1544_v63, %v1302_v0 }
  0xf1   : > { %v813_v10 = vpop.f32.mrf.mxu2 }
  0xf2   : > { %v814_v11 = vadd.f32 %v1936_v48, %v813_v10  ;;  %v982_v12 = vpop.f32.mrf.mxu3  ;;  %v1433_v10 = vor.u32 %v1576_v1, %v1430_v2 }
  0xf3   : > { %v736_v15 = vpop.f32.mrf.mxu0 }
  0xf4   : > { %v983_v18 = vadd.f32 %v982_v12, %v814_v11  ;;  %v737_v19 = vadd.f32 %v1936_v48, %v736_v15  ;;  %v905_v20 = vpop.f32.mrf.mxu1 }
  0xf6   : > { %1088 = vst.msk [vmem:[%s1950_s21 + $0x128] sm:$0xff] %vm1050_vm0, %v983_v18  ;;  %v906_v21 = vadd.f32 %v905_v20, %v737_v19  ;;  %775 = vmatmul.bf16.gmra.mxu0 %v1285_v13  ;;  %855 = vmatmul.bf16.gmra.mxu2 %v1413_v14 }
  0xf7   : > { %944 = vmatmul.bf16.gmra.mxu1 %v1289_v16  ;;  %1024 = vmatmul.bf16.gmra.mxu3 %v1417_v17 }
  0xf8   : > { %1057 = vst.msk [vmem:[%s1950_s21 + $0x30] sm:$0xff] %vm1050_vm0, %v906_v21 }
  0xf9   : > { %v816_v22 = vpop.f32.mrf.mxu2 }
  0xfa   : > { %v817_v23 = vadd.f32 %v1936_v48, %v816_v22  ;;  %v985_v24 = vpop.f32.mrf.mxu3  ;;  %v1308_v22 = vld [vmem:[%s1813_s26 + $0xe0] sm:$0xf] }
  0xfb   : > { %v738_v25 = vpop.f32.mrf.mxu0 }
  0xfc   : > { %v986_v26 = vadd.f32 %v985_v24, %v817_v23  ;;  %v739_v27 = vadd.f32 %v1936_v48, %v738_v25  ;;  %v907_v28 = vpop.f32.mrf.mxu1  ;;  %v1547_v24 = vld [vmem:[%s1813_s26 + $0xe4] sm:$0xf0]  ;;  %v1436_v25 = vld [vmem:[%s1813_s26 + $0x1e0] sm:$0xf] }
  0xfd   : > { %v1309_v34 = vor.u32 %v1547_v24, %v1308_v22 }
  0xfe   : > { %1089 = vst.msk [vmem:[%s1950_s21 + $0x130] sm:$0xff] %vm1050_vm0, %v986_v26  ;;  %v908_v30 = vadd.f32 %v907_v28, %v739_v27  ;;  %v1579_v26 = vld [vmem:[%s1813_s26 + $0x1e4] sm:$0xf0]  ;;  %v1546_v27 = vld [vmem:[%s1813_s26 + $0xe4] sm:$0xf] }
  0xff   : > { %v1310_v28 = vld [vmem:[%s1813_s26 + $0xe8] sm:$0xf0]  ;;  %v1437_v35 = vor.u32 %v1579_v26, %v1436_v25 }
 0x100   : > { %1058 = vst.msk [vmem:[%s1950_s21 + $0x38] sm:$0xff] %vm1050_vm0, %v908_v30  ;;  %v1438_v30 = vld [vmem:[%s1813_s26 + $0x1e8] sm:$0xf0]  ;;  %v1313_v37 = vor.u32 %v1546_v27, %v1310_v28 }
 0x101   : > { %v818_v38 = vpop.f32.mrf.mxu2 }
 0x102   : > { %v819_v39 = vadd.f32 %v1936_v48, %v818_v38  ;;  %v987_v40 = vpop.f32.mrf.mxu3  ;;  %v1441_v38 = vor.u32 %v1578_v29, %v1438_v30 }
 0x103   : > { %v741_v43 = vpop.f32.mrf.mxu0 }
 0x104   : > { %v988_v46 = vadd.f32 %v987_v40, %v819_v39  ;;  %v742_v47 = vadd.f32 %v1936_v48, %v741_v43  ;;  %v910_v49 = vpop.f32.mrf.mxu1 }
 0x106   : > { %1090 = vst.msk [vmem:[%s1950_s21 + $0x138] sm:$0xff] %vm1050_vm0, %v988_v46  ;;  %v911_v50 = vadd.f32 %v910_v49, %v742_v47  ;;  %780 = vmatmul.bf16.gmra.mxu0 %v1293_v41  ;;  %860 = vmatmul.bf16.gmra.mxu2 %v1421_v42 }
 0x107   : > { %949 = vmatmul.bf16.gmra.mxu1 %v1297_v44  ;;  %1029 = vmatmul.bf16.gmra.mxu3 %v1425_v45 }
 0x108   : > { %1059 = vst.msk [vmem:[%s1950_s21 + $0x40] sm:$0xff] %vm1050_vm0, %v911_v50 }
 0x109   : > { %v821_v51 = vpop.f32.mrf.mxu2 }
 0x10a   : > { %v822_v52 = vadd.f32 %v1936_v48, %v821_v51  ;;  %v990_v53 = vpop.f32.mrf.mxu3  ;;  %v1316_v51 = vld [vmem:[%s1813_s26 + $0xf0] sm:$0xf] }
 0x10b   : > { %v743_v54 = vpop.f32.mrf.mxu0 }
 0x10c   : > { %v991_v55 = vadd.f32 %v990_v53, %v822_v52  ;;  %v744_v56 = vadd.f32 %v1936_v48, %v743_v54  ;;  %v912_v57 = vpop.f32.mrf.mxu1  ;;  %v1549_v53 = vld [vmem:[%s1813_s26 + $0xf4] sm:$0xf0]  ;;  %v1444_v54 = vld [vmem:[%s1813_s26 + $0x1f0] sm:$0xf] }
 0x10d   : > { %v1317_v63 = vor.u32 %v1549_v53, %v1316_v51 }
 0x10e   : > { %1091 = vst.msk [vmem:[%s1950_s21 + $0x140] sm:$0xff] %vm1050_vm0, %v991_v55  ;;  %v913_v59 = vadd.f32 %v912_v57, %v744_v56  ;;  %v1581_v55 = vld [vmem:[%s1813_s26 + $0x1f4] sm:$0xf0]  ;;  %v1548_v56 = vld [vmem:[%s1813_s26 + $0xf4] sm:$0xf] }
 0x10f   : > { %v1318_v57 = vld [vmem:[%s1813_s26 + $0xf8] sm:$0xf0]  ;;  %v1445_v0 = vor.u32 %v1581_v55, %v1444_v54 }
 0x110   : > { %1060 = vst.msk [vmem:[%s1950_s21 + $0x48] sm:$0xff] %vm1050_vm0, %v913_v59  ;;  %v1446_v59 = vld [vmem:[%s1813_s26 + $0x1f8] sm:$0xf0]  ;;  %v1321_v2 = vor.u32 %v1548_v56, %v1318_v57 }
 0x111   : > { %v823_v3 = vpop.f32.mrf.mxu2 }
 0x112   : > { %v824_v4 = vadd.f32 %v1936_v48, %v823_v3  ;;  %v992_v5 = vpop.f32.mrf.mxu3  ;;  %v1449_v3 = vor.u32 %v1580_v58, %v1446_v59 }
 0x113   : > { %v746_v8 = vpop.f32.mrf.mxu0 }
 0x114   : > { %v993_v11 = vadd.f32 %v992_v5, %v824_v4  ;;  %v747_v12 = vadd.f32 %v1936_v48, %v746_v8  ;;  %v915_v13 = vpop.f32.mrf.mxu1 }
 0x116   : > { %1092 = vst.msk [vmem:[%s1950_s21 + $0x148] sm:$0xff] %vm1050_vm0, %v993_v11  ;;  %v916_v14 = vadd.f32 %v915_v13, %v747_v12  ;;  %785 = vmatmul.bf16.gmra.mxu0 %v1301_v6  ;;  %865 = vmatmul.bf16.gmra.mxu2 %v1429_v7 }
 0x117   : > { %954 = vmatmul.bf16.gmra.mxu1 %v1305_v9  ;;  %1034 = vmatmul.bf16.gmra.mxu3 %v1433_v10 }
 0x118   : > { %1061 = vst.msk [vmem:[%s1950_s21 + $0x50] sm:$0xff] %vm1050_vm0, %v916_v14 }
 0x119   : > { %v826_v15 = vpop.f32.mrf.mxu2 }
 0x11a   : > { %v827_v16 = vadd.f32 %v1936_v48, %v826_v15  ;;  %v995_v17 = vpop.f32.mrf.mxu3 }
 0x11b   : > { %v748_v18 = vpop.f32.mrf.mxu0 }
 0x11c   : > { %v996_v19 = vadd.f32 %v995_v17, %v827_v16  ;;  %v749_v20 = vadd.f32 %v1936_v48, %v748_v18  ;;  %v917_v21 = vpop.f32.mrf.mxu1 }
 0x11e   : > { %1093 = vst.msk [vmem:[%s1950_s21 + $0x150] sm:$0xff] %vm1050_vm0, %v996_v19  ;;  %v918_v23 = vadd.f32 %v917_v21, %v749_v20 }
 0x120   : > { %1062 = vst.msk [vmem:[%s1950_s21 + $0x58] sm:$0xff] %vm1050_vm0, %v918_v23 }
 0x121   : > { %v828_v31 = vpop.f32.mrf.mxu2 }
 0x122   : > { %v829_v32 = vadd.f32 %v1936_v48, %v828_v31  ;;  %v997_v33 = vpop.f32.mrf.mxu3 }
 0x123   : > { %v751_v36 = vpop.f32.mrf.mxu0 }
 0x124   : > { %v998_v39 = vadd.f32 %v997_v33, %v829_v32  ;;  %v752_v40 = vadd.f32 %v1936_v48, %v751_v36  ;;  %v920_v41 = vpop.f32.mrf.mxu1 }
 0x126   : > { %1094 = vst.msk [vmem:[%s1950_s21 + $0x158] sm:$0xff] %vm1050_vm0, %v998_v39  ;;  %v921_v42 = vadd.f32 %v920_v41, %v752_v40  ;;  %790 = vmatmul.bf16.gmra.mxu0 %v1309_v34  ;;  %870 = vmatmul.bf16.gmra.mxu2 %v1437_v35 }
 0x127   : > { %959 = vmatmul.bf16.gmra.mxu1 %v1313_v37  ;;  %1039 = vmatmul.bf16.gmra.mxu3 %v1441_v38 }
 0x128   : > { %1063 = vst.msk [vmem:[%s1950_s21 + $0x60] sm:$0xff] %vm1050_vm0, %v921_v42 }
 0x129   : > { %v831_v43 = vpop.f32.mrf.mxu2 }
 0x12a   : > { %v832_v44 = vadd.f32 %v1936_v48, %v831_v43  ;;  %v1000_v45 = vpop.f32.mrf.mxu3 }
 0x12b   : > { %v753_v46 = vpop.f32.mrf.mxu0 }
 0x12c   : > { %v1001_v47 = vadd.f32 %v1000_v45, %v832_v44  ;;  %v754_v49 = vadd.f32 %v1936_v48, %v753_v46  ;;  %v922_v50 = vpop.f32.mrf.mxu1 }
 0x12e   : > { %1095 = vst.msk [vmem:[%s1950_s21 + $0x160] sm:$0xff] %vm1050_vm0, %v1001_v47  ;;  %v923_v52 = vadd.f32 %v922_v50, %v754_v49 }
 0x130   : > { %1064 = vst.msk [vmem:[%s1950_s21 + $0x68] sm:$0xff] %vm1050_vm0, %v923_v52 }
 0x131   : > { %v833_v60 = vpop.f32.mrf.mxu2 }
 0x132   : > { %v834_v61 = vadd.f32 %v1936_v48, %v833_v60  ;;  %v1002_v62 = vpop.f32.mrf.mxu3 }
 0x133   : > { %v756_v1 = vpop.f32.mrf.mxu0 }
 0x134   : > { %v1003_v4 = vadd.f32 %v1002_v62, %v834_v61  ;;  %v757_v5 = vadd.f32 %v1936_v48, %v756_v1  ;;  %v925_v6 = vpop.f32.mrf.mxu1 }
 0x136   : > { %1096 = vst.msk [vmem:[%s1950_s21 + $0x168] sm:$0xff] %vm1050_vm0, %v1003_v4  ;;  %v926_v7 = vadd.f32 %v925_v6, %v757_v5  ;;  %795 = vmatmul.bf16.gmra.mxu0 %v1317_v63  ;;  %875 = vmatmul.bf16.gmra.mxu2 %v1445_v0 }
 0x137   : > { %964 = vmatmul.bf16.gmra.mxu1 %v1321_v2  ;;  %1044 = vmatmul.bf16.gmra.mxu3 %v1449_v3 }
 0x138   : > { %1065 = vst.msk [vmem:[%s1950_s21 + $0x70] sm:$0xff] %vm1050_vm0, %v926_v7 }
 0x139   : > { %v836_v8 = vpop.f32.mrf.mxu2 }
 0x13a   : > { %v837_v9 = vadd.f32 %v1936_v48, %v836_v8  ;;  %v1005_v10 = vpop.f32.mrf.mxu3 }
 0x13b   : > { %v758_v11 = vpop.f32.mrf.mxu0 }
 0x13c   : > { %v1006_v12 = vadd.f32 %v1005_v10, %v837_v9  ;;  %v759_v13 = vadd.f32 %v1936_v48, %v758_v11  ;;  %v927_v14 = vpop.f32.mrf.mxu1 }
 0x13e   : > { %1097 = vst.msk [vmem:[%s1950_s21 + $0x170] sm:$0xff] %vm1050_vm0, %v1006_v12  ;;  %v928_v15 = vadd.f32 %v927_v14, %v759_v13 }
 0x140   : > { %1066 = vst.msk [vmem:[%s1950_s21 + $0x78] sm:$0xff] %vm1050_vm0, %v928_v15 }
 0x141   : > { %v838_v16 = vpop.f32.mrf.mxu2 }
 0x142   : > { %v839_v17 = vadd.f32 %v1936_v48, %v838_v16  ;;  %v1007_v18 = vpop.f32.mrf.mxu3 }
 0x143   : > { %v761_v19 = vpop.f32.mrf.mxu0 }
 0x144   : > { %v1008_v20 = vadd.f32 %v1007_v18, %v839_v17  ;;  %v762_v21 = vadd.f32 %v1936_v48, %v761_v19  ;;  %v930_v22 = vpop.f32.mrf.mxu1 }
 0x146   : > { %1098 = vst.msk [vmem:[%s1950_s21 + $0x178] sm:$0xff] %vm1050_vm0, %v1008_v20  ;;  %v931_v23 = vadd.f32 %v930_v22, %v762_v21 }
 0x148   : > { %1067 = vst.msk [vmem:[%s1950_s21 + $0x80] sm:$0xff] %vm1050_vm0, %v931_v23 }
 0x149   : > { %v841_v24 = vpop.f32.mrf.mxu2 }
 0x14a   : > { %v842_v25 = vadd.f32 %v1936_v48, %v841_v24  ;;  %v1010_v26 = vpop.f32.mrf.mxu3 }
 0x14b   : > { %v763_v27 = vpop.f32.mrf.mxu0 }
 0x14c   : > { %v1011_v28 = vadd.f32 %v1010_v26, %v842_v25  ;;  %v764_v29 = vadd.f32 %v1936_v48, %v763_v27  ;;  %v932_v30 = vpop.f32.mrf.mxu1 }
 0x14e   : > { %1099 = vst.msk [vmem:[%s1950_s21 + $0x180] sm:$0xff] %vm1050_vm0, %v1011_v28  ;;  %v933_v31 = vadd.f32 %v932_v30, %v764_v29 }
 0x150   : > { %1068 = vst.msk [vmem:[%s1950_s21 + $0x88] sm:$0xff] %vm1050_vm0, %v933_v31 }
 0x151   : > { %v843_v32 = vpop.f32.mrf.mxu2 }
 0x152   : > { %v844_v33 = vadd.f32 %v1936_v48, %v843_v32  ;;  %v1012_v34 = vpop.f32.mrf.mxu3 }
 0x153   : > { %v766_v35 = vpop.f32.mrf.mxu0 }
 0x154   : > { %v1013_v36 = vadd.f32 %v1012_v34, %v844_v33  ;;  %v767_v37 = vadd.f32 %v1936_v48, %v766_v35  ;;  %v935_v38 = vpop.f32.mrf.mxu1 }
 0x156   : > { %1100 = vst.msk [vmem:[%s1950_s21 + $0x188] sm:$0xff] %vm1050_vm0, %v1013_v36  ;;  %v936_v39 = vadd.f32 %v935_v38, %v767_v37 }
 0x158   : > { %1069 = vst.msk [vmem:[%s1950_s21 + $0x90] sm:$0xff] %vm1050_vm0, %v936_v39 }
 0x159   : > { %v846_v40 = vpop.f32.mrf.mxu2 }
 0x15a   : > { %v847_v41 = vadd.f32 %v1936_v48, %v846_v40  ;;  %v1015_v42 = vpop.f32.mrf.mxu3 }
 0x15b   : > { %v768_v43 = vpop.f32.mrf.mxu0 }
 0x15c   : > { %v1016_v44 = vadd.f32 %v1015_v42, %v847_v41  ;;  %v769_v45 = vadd.f32 %v1936_v48, %v768_v43  ;;  %v937_v46 = vpop.f32.mrf.mxu1 }
 0x15e   : > { %1101 = vst.msk [vmem:[%s1950_s21 + $0x190] sm:$0xff] %vm1050_vm0, %v1016_v44  ;;  %v938_v47 = vadd.f32 %v937_v46, %v769_v45 }
 0x160   : > { %1070 = vst.msk [vmem:[%s1950_s21 + $0x98] sm:$0xff] %vm1050_vm0, %v938_v47 }
 0x161   : > { %v848_v49 = vpop.f32.mrf.mxu2 }
 0x162   : > { %v849_v50 = vadd.f32 %v1936_v48, %v848_v49  ;;  %v1017_v51 = vpop.f32.mrf.mxu3 }
 0x163   : > { %v771_v52 = vpop.f32.mrf.mxu0 }
 0x164   : > { %v1018_v53 = vadd.f32 %v1017_v51, %v849_v50  ;;  %v772_v54 = vadd.f32 %v1936_v48, %v771_v52  ;;  %v940_v55 = vpop.f32.mrf.mxu1 }
 0x166   : > { %1102 = vst.msk [vmem:[%s1950_s21 + $0x198] sm:$0xff] %vm1050_vm0, %v1018_v53  ;;  %v941_v56 = vadd.f32 %v940_v55, %v772_v54 }
 0x168   : > { %1071 = vst.msk [vmem:[%s1950_s21 + $0xa0] sm:$0xff] %vm1050_vm0, %v941_v56 }
 0x169   : > { %v851_v57 = vpop.f32.mrf.mxu2 }
 0x16a   : > { %v852_v58 = vadd.f32 %v1936_v48, %v851_v57  ;;  %v1020_v59 = vpop.f32.mrf.mxu3 }
 0x16b   : > { %v773_v60 = vpop.f32.mrf.mxu0 }
 0x16c   : > { %v1021_v61 = vadd.f32 %v1020_v59, %v852_v58  ;;  %v774_v62 = vadd.f32 %v1936_v48, %v773_v60  ;;  %v942_v63 = vpop.f32.mrf.mxu1 }
 0x16e   : > { %1103 = vst.msk [vmem:[%s1950_s21 + $0x1a0] sm:$0xff] %vm1050_vm0, %v1021_v61  ;;  %v943_v0 = vadd.f32 %v942_v63, %v774_v62 }
 0x170   : > { %1072 = vst.msk [vmem:[%s1950_s21 + $0xa8] sm:$0xff] %vm1050_vm0, %v943_v0 }
 0x171   : > { %v853_v1 = vpop.f32.mrf.mxu2 }
 0x172   : > { %v854_v2 = vadd.f32 %v1936_v48, %v853_v1  ;;  %v1022_v3 = vpop.f32.mrf.mxu3 }
 0x173   : > { %v776_v4 = vpop.f32.mrf.mxu0 }
 0x174   : > { %v1023_v5 = vadd.f32 %v1022_v3, %v854_v2  ;;  %v777_v6 = vadd.f32 %v1936_v48, %v776_v4  ;;  %v945_v7 = vpop.f32.mrf.mxu1 }
 0x176   : > { %1104 = vst.msk [vmem:[%s1950_s21 + $0x1a8] sm:$0xff] %vm1050_vm0, %v1023_v5  ;;  %v946_v8 = vadd.f32 %v945_v7, %v777_v6 }
 0x178   : > { %1073 = vst.msk [vmem:[%s1950_s21 + $0xb0] sm:$0xff] %vm1050_vm0, %v946_v8 }
 0x179   : > { %v856_v9 = vpop.f32.mrf.mxu2 }
 0x17a   : > { %v857_v10 = vadd.f32 %v1936_v48, %v856_v9  ;;  %v1025_v11 = vpop.f32.mrf.mxu3 }
 0x17b   : > { %v778_v12 = vpop.f32.mrf.mxu0 }
 0x17c   : > { %v1026_v13 = vadd.f32 %v1025_v11, %v857_v10  ;;  %v779_v14 = vadd.f32 %v1936_v48, %v778_v12  ;;  %v947_v15 = vpop.f32.mrf.mxu1 }
 0x17e   : > { %1105 = vst.msk [vmem:[%s1950_s21 + $0x1b0] sm:$0xff] %vm1050_vm0, %v1026_v13  ;;  %v948_v16 = vadd.f32 %v947_v15, %v779_v14 }
 0x180   : > { %1074 = vst.msk [vmem:[%s1950_s21 + $0xb8] sm:$0xff] %vm1050_vm0, %v948_v16 }
 0x181   : > { %v858_v17 = vpop.f32.mrf.mxu2 }
 0x182   : > { %v859_v18 = vadd.f32 %v1936_v48, %v858_v17  ;;  %v1027_v19 = vpop.f32.mrf.mxu3 }
 0x183   : > { %v781_v20 = vpop.f32.mrf.mxu0 }
 0x184   : > { %v1028_v21 = vadd.f32 %v1027_v19, %v859_v18  ;;  %v782_v22 = vadd.f32 %v1936_v48, %v781_v20  ;;  %v950_v23 = vpop.f32.mrf.mxu1 }
 0x186   : > { %1106 = vst.msk [vmem:[%s1950_s21 + $0x1b8] sm:$0xff] %vm1050_vm0, %v1028_v21  ;;  %v951_v24 = vadd.f32 %v950_v23, %v782_v22 }
 0x188   : > { %1075 = vst.msk [vmem:[%s1950_s21 + $0xc0] sm:$0xff] %vm1050_vm0, %v951_v24 }
 0x189   : > { %v861_v25 = vpop.f32.mrf.mxu2 }
 0x18a   : > { %v862_v26 = vadd.f32 %v1936_v48, %v861_v25  ;;  %v1030_v27 = vpop.f32.mrf.mxu3 }
 0x18b   : > { %v783_v28 = vpop.f32.mrf.mxu0 }
 0x18c   : > { %v1031_v29 = vadd.f32 %v1030_v27, %v862_v26  ;;  %v784_v30 = vadd.f32 %v1936_v48, %v783_v28  ;;  %v952_v31 = vpop.f32.mrf.mxu1 }
 0x18e   : > { %1107 = vst.msk [vmem:[%s1950_s21 + $0x1c0] sm:$0xff] %vm1050_vm0, %v1031_v29  ;;  %v953_v32 = vadd.f32 %v952_v31, %v784_v30 }
 0x190   : > { %1076 = vst.msk [vmem:[%s1950_s21 + $0xc8] sm:$0xff] %vm1050_vm0, %v953_v32 }
 0x191   : > { %v863_v33 = vpop.f32.mrf.mxu2 }
 0x192   : > { %v864_v34 = vadd.f32 %v1936_v48, %v863_v33  ;;  %v1032_v35 = vpop.f32.mrf.mxu3 }
 0x193   : > { %v786_v36 = vpop.f32.mrf.mxu0 }
 0x194   : > { %v1033_v37 = vadd.f32 %v1032_v35, %v864_v34  ;;  %v787_v38 = vadd.f32 %v1936_v48, %v786_v36  ;;  %v955_v39 = vpop.f32.mrf.mxu1 }
 0x196   : > { %1108 = vst.msk [vmem:[%s1950_s21 + $0x1c8] sm:$0xff] %vm1050_vm0, %v1033_v37  ;;  %v956_v40 = vadd.f32 %v955_v39, %v787_v38 }
 0x198   : > { %1077 = vst.msk [vmem:[%s1950_s21 + $0xd0] sm:$0xff] %vm1050_vm0, %v956_v40 }
 0x199   : > { %v866_v41 = vpop.f32.mrf.mxu2 }
 0x19a   : > { %v867_v42 = vadd.f32 %v1936_v48, %v866_v41  ;;  %v1035_v43 = vpop.f32.mrf.mxu3 }
 0x19b   : > { %v788_v44 = vpop.f32.mrf.mxu0 }
 0x19c   : > { %v1036_v45 = vadd.f32 %v1035_v43, %v867_v42  ;;  %v789_v46 = vadd.f32 %v1936_v48, %v788_v44  ;;  %v957_v47 = vpop.f32.mrf.mxu1 }
 0x19e   : > { %1109 = vst.msk [vmem:[%s1950_s21 + $0x1d0] sm:$0xff] %vm1050_vm0, %v1036_v45  ;;  %v958_v49 = vadd.f32 %v957_v47, %v789_v46 }
 0x1a0   : > { %1078 = vst.msk [vmem:[%s1950_s21 + $0xd8] sm:$0xff] %vm1050_vm0, %v958_v49 }
 0x1a1   : > { %v868_v50 = vpop.f32.mrf.mxu2 }
 0x1a2   : > { %v869_v51 = vadd.f32 %v1936_v48, %v868_v50  ;;  %v1037_v52 = vpop.f32.mrf.mxu3 }
 0x1a3   : > { %v791_v53 = vpop.f32.mrf.mxu0 }
 0x1a4   : > { %v1038_v54 = vadd.f32 %v1037_v52, %v869_v51  ;;  %v792_v55 = vadd.f32 %v1936_v48, %v791_v53  ;;  %v960_v56 = vpop.f32.mrf.mxu1 }
 0x1a6   : > { %1110 = vst.msk [vmem:[%s1950_s21 + $0x1d8] sm:$0xff] %vm1050_vm0, %v1038_v54  ;;  %v961_v57 = vadd.f32 %v960_v56, %v792_v55 }
 0x1a8   : > { %1079 = vst.msk [vmem:[%s1950_s21 + $0xe0] sm:$0xff] %vm1050_vm0, %v961_v57 }
 0x1a9   : > { %v871_v58 = vpop.f32.mrf.mxu2 }
 0x1aa   : > { %v872_v59 = vadd.f32 %v1936_v48, %v871_v58  ;;  %v1040_v60 = vpop.f32.mrf.mxu3 }
 0x1ab   : > { %v793_v61 = vpop.f32.mrf.mxu0 }
 0x1ac   : > { %v1041_v62 = vadd.f32 %v1040_v60, %v872_v59  ;;  %v794_v63 = vadd.f32 %v1936_v48, %v793_v61  ;;  %v962_v0 = vpop.f32.mrf.mxu1 }
 0x1ae   : > { %1111 = vst.msk [vmem:[%s1950_s21 + $0x1e0] sm:$0xff] %vm1050_vm0, %v1041_v62  ;;  %v963_v1 = vadd.f32 %v962_v0, %v794_v63 }
 0x1b0   : > { %1080 = vst.msk [vmem:[%s1950_s21 + $0xe8] sm:$0xff] %vm1050_vm0, %v963_v1 }
 0x1b1   : > { %v873_v2 = vpop.f32.mrf.mxu2 }
 0x1b2   : > { %v874_v3 = vadd.f32 %v1936_v48, %v873_v2  ;;  %v1042_v4 = vpop.f32.mrf.mxu3 }
 0x1b3   : > { %v796_v5 = vpop.f32.mrf.mxu0 }
 0x1b4   : > { %v1043_v6 = vadd.f32 %v1042_v4, %v874_v3  ;;  %v797_v7 = vadd.f32 %v1936_v48, %v796_v5  ;;  %v965_v8 = vpop.f32.mrf.mxu1 }
 0x1b6   : > { %1112 = vst.msk [vmem:[%s1950_s21 + $0x1e8] sm:$0xff] %vm1050_vm0, %v1043_v6  ;;  %v966_v9 = vadd.f32 %v965_v8, %v797_v7 }
 0x1b8   : > { %1081 = vst.msk [vmem:[%s1950_s21 + $0xf0] sm:$0xff] %vm1050_vm0, %v966_v9 }
 0x1b9   : > { %v876_v10 = vpop.f32.mrf.mxu2 }
 0x1ba   : > { %v877_v11 = vadd.f32 %v1936_v48, %v876_v10  ;;  %v1045_v12 = vpop.f32.mrf.mxu3 }
 0x1bb   : > { %v798_v13 = vpop.f32.mrf.mxu0 }
 0x1bc   : > { %v1046_v14 = vadd.f32 %v1045_v12, %v877_v11  ;;  %v799_v15 = vadd.f32 %v1936_v48, %v798_v13  ;;  %v967_v16 = vpop.f32.mrf.mxu1 }
 0x1be   : > { %1113 = vst.msk [vmem:[%s1950_s21 + $0x1f0] sm:$0xff] %vm1050_vm0, %v1046_v14  ;;  %v968_v17 = vadd.f32 %v967_v16, %v799_v15 }
 0x1c0   : > { %1082 = vst.msk [vmem:[%s1950_s21 + $0xf8] sm:$0xff] %vm1050_vm0, %v968_v17 }
 0x1c1   : > { %v878_v18 = vpop.f32.mrf.mxu2 }
 0x1c2   : > { %v879_v19 = vadd.f32 %v1936_v48, %v878_v18  ;;  %v1047_v20 = vpop.f32.mrf.mxu3 }
 0x1c4   : > { %v1048_v21 = vadd.f32 %v1047_v20, %v879_v19 }
 0x1c6   : > { %1114 = vst.msk [vmem:[%s1950_s21 + $0x1f8] sm:$0xff] %vm1050_vm0, %v1048_v21 }
 0x1c7 PF: > { %p13_p7 = scmp.ge.s32.totalorder %s1764_s17, 4   ;;  %s2219_s12 = smov %s1712_s13 }
 0x1c8   : > { %s2220_s13 = smov %s1716_s14  ;;  %s2221_s14 = smov %s1774_s20 }
 0x1c9   : > { %s2222_s15 = smov %s1764_s17  ;;  %15 = sbr.rel (!%p13_p7) target bundleno = 3 (0x3), region = 72 }
 0x1ce   :  { %1137 = vsyncpa [#allocation3], 1 }
 0x1cf   :  { %1139 = vsyncpa [#allocation3 + $0x1], 1 }

</bundles_post_ra>
